<compile_context>
chip_gen: v7x
topology: tpu7x:2x2x1
jax: 0.10.0
libtpu: 0.0.40
codegen_flags: <defaults>
</compile_context>

<pallas_src>
import math

import jax
import jax.numpy as jnp
from jax.experimental import pallas as pl
from jax.experimental.pallas import tpu as pltpu

_IN = 10
_HIDDEN = 200


def _fused_kernel(x_ref, w1_ref, b1_ref, w2_ref, b2_ref, o_ref):
    # fc1 + tanh: tiny (1,10)@(10,200) MXU matmul + 200 EUP tanh, recomputed
    # each step (negligible, hidden under the w2 tile DMA). x/w1/b1 have
    # constant index maps so they stay VMEM-resident across the grid.
    h = jnp.tanh(
        jnp.dot(x_ref[...], w1_ref[...], preferred_element_type=jnp.float32)
        + b1_ref[...]
    )
    # fc2 for one lane tile: only w2/b2 stream from HBM each grid step.
    o_ref[...] = (
        jnp.dot(h, w2_ref[...], preferred_element_type=jnp.float32)
        + b2_ref[...]
    ).astype(o_ref.dtype)


def _round_up(x, m):
    return ((x + m - 1) // m) * m


def _pick_tile_and_semantics():
    """Per-generation fc2 lane tile + grid-axis semantics."""
    kind = ""
    try:
        kind = jax.devices()[0].device_kind.lower()
    except Exception:
        pass
    if ("v5 lite" in kind) or ("v5e" in kind) or ("v5litepod" in kind):
        tn = 4096   # double-buffered w2 tile = 2*200*4096*4B ~ 6.6 MiB
    else:
        tn = 8192   # 2*200*8192*4B ~ 13.1 MiB; fits 32 MiB scoped VMEM
    if ("v7" in kind) and hasattr(pltpu, "CORE_PARALLEL"):
        # Explicitly shard the lane axis across v7x's two TensorCores.
        dim_sem = (pltpu.CORE_PARALLEL,)
    else:
        dim_sem = ("parallel",)
    return tn, dim_sem


def variable_from_network(params, shape, *, tn=None):
    """Runs the VariableFromNetwork forward pass; returns an array of `shape`."""
    w1, b1, w2, b2 = params  # w1:(10,200) b1:(1,200) w2:(200,P) b2:(1,P)
    out_dim = w2.shape[1]
    x = jnp.ones((1, _IN), dtype=jnp.float32)  # torch.ones(1, 10)

    tn_auto, dim_sem = _pick_tile_and_semantics()
    if tn is None:
        tn = tn_auto
    tn = max(128, (tn // 128) * 128)                 # 128-lane aligned
    tn = min(tn, _round_up(out_dim, 128))            # don't exceed the output
    grid_n = pl.cdiv(out_dim, tn)                    # ragged last tile OK

    cost = pl.CostEstimate(
        flops=grid_n * 2 * _IN * _HIDDEN + 2 * _HIDDEN * out_dim + out_dim,
        transcendentals=grid_n * _HIDDEN,
        bytes_accessed=4 * (_HIDDEN * out_dim + 2 * out_dim
                            + _IN * _HIDDEN + _HIDDEN + _IN),
    )

    flat = pl.pallas_call(
        _fused_kernel,
        out_shape=jax.ShapeDtypeStruct((1, out_dim), jnp.float32),
        grid_spec=pltpu.PrefetchScalarGridSpec(
            num_scalar_prefetch=0,
            grid=(grid_n,),
            in_specs=[
                pl.BlockSpec((1, _IN), lambda n: (0, 0)),        # x:  resident
                pl.BlockSpec((_IN, _HIDDEN), lambda n: (0, 0)),  # w1: resident
                pl.BlockSpec((1, _HIDDEN), lambda n: (0, 0)),    # b1: resident
                pl.BlockSpec((_HIDDEN, tn), lambda n: (0, n)),   # w2: streamed
                pl.BlockSpec((1, tn), lambda n: (0, n)),         # b2: streamed
            ],
            out_specs=pl.BlockSpec((1, tn), lambda n: (0, n)),
        ),
        compiler_params=pltpu.CompilerParams(
            dimension_semantics=dim_sem,
            # Explicit scoped-VMEM budget so TN=8192 is safe even on chips
            # whose default limit is 16 MiB (well under physical VMEM everywhere).
            vmem_limit_bytes=32 * 1024 * 1024,
        ),
        cost_estimate=cost,
    )(x, w1, b1, w2, b2)

    return flat.reshape(shape)  # x.view(self.shape)


def init_params(key, shape):
    """Deterministic init matching nn.Linear's default U(-1/sqrt(fan_in), ...)."""
    out_total = int(math.prod(shape))
    k1, k2, k3, k4 = jax.random.split(key, 4)

    bound1 = 1.0 / math.sqrt(float(_IN))
    # stored pre-transposed: (in, out)
    w1 = jax.random.uniform(k1, (_IN, _HIDDEN), jnp.float32, -bound1, bound1)
    b1 = jax.random.uniform(k2, (1, _HIDDEN), jnp.float32, -bound1, bound1)

    bound2 = 1.0 / math.sqrt(float(_HIDDEN))
    w2 = jax.random.uniform(k3, (_HIDDEN, out_total), jnp.float32, -bound2, bound2)
    b2 = jax.random.uniform(k4, (1, out_total), jnp.float32, -bound2, bound2)
    return (w1, b1, w2, b2)


if __name__ == "__main__":
    key = jax.random.PRNGKey(0)

    # Small demo shapes consistent with the module:
    #   (8, 32)   -> prod = 256  (lane-aligned, single tile)
    #   (3, 100)  -> prod = 300  (ragged, exercises the masked last tile)
    #   (16, 600) -> prod = 9600 (multi-tile grid + ragged last tile on TN=8192)
    for target_shape in [(8, 32), (3, 100), (16, 600)]:
        params = init_params(key, target_shape)
        out = jax.block_until_ready(variable_from_network(params, target_shape))

        # Pure-JAX reference (same math outside Pallas).
        x = jnp.ones((1, _IN), dtype=jnp.float32)
        w1, b1, w2, b2 = params
        ref = (jnp.tanh(x @ w1 + b1) @ w2 + b2).reshape(target_shape)

        assert out.shape == tuple(target_shape)
        assert jnp.allclose(out, ref, atol=1e-4, rtol=1e-4), (
            f"mismatch for shape {target_shape}: "
            f"max abs diff = {float(jnp.max(jnp.abs(out - ref)))}"
        )

    print("KERNEL_OK")
</pallas_src>

<mosaic_0001>
module attributes {stable_mosaic.version = 11 : i64} {
  func.func @_fused_kernel(%arg0: i32, %arg1: memref<1x10xf32, #tpu.memory_space<vmem>>, %arg2: memref<10x200xf32, #tpu.memory_space<vmem>>, %arg3: memref<1x200xf32, #tpu.memory_space<vmem>>, %arg4: memref<200x256xf32, #tpu.memory_space<vmem>>, %arg5: memref<1x256xf32, #tpu.memory_space<vmem>>, %arg6: memref<1x256xf32, #tpu.memory_space<vmem>>) attributes {dimension_semantics = [#tpu.dimension_semantics<parallel>], iteration_bounds = array<i64: 1>, scalar_prefetch = 0 : i64, scratch_operands = 0 : i64, tpu.core_type = #tpu.core_type<tc>, window_params = [{pipeline_mode = #tpu.pipeline_mode<synchronous>, transform_indices = @transform_0, window_bounds = array<i64: 1, 10>}, {pipeline_mode = #tpu.pipeline_mode<synchronous>, transform_indices = @transform_1, window_bounds = array<i64: 10, 200>}, {pipeline_mode = #tpu.pipeline_mode<synchronous>, transform_indices = @transform_2, window_bounds = array<i64: 1, 200>}, {transform_indices = @transform_3, window_bounds = array<i64: 200, 256>}, {transform_indices = @transform_4, window_bounds = array<i64: 1, 256>}, {transform_indices = @transform_5, window_bounds = array<i64: 1, 256>}]} {
    %c0 = arith.constant 0 : index
    %c0_0 = arith.constant 0 : index
    %0 = vector.load %arg1[%c0, %c0_0] : memref<1x10xf32, #tpu.memory_space<vmem>>, vector<1x10xf32>
    %c0_1 = arith.constant 0 : index
    %c0_2 = arith.constant 0 : index
    %1 = vector.load %arg2[%c0_1, %c0_2] : memref<10x200xf32, #tpu.memory_space<vmem>>, vector<10x200xf32>
    %cst = arith.constant dense<0.000000e+00> : vector<1x200xf32>
    %2 = tpu.matmul %0, %1, %cst {dimension_numbers = #tpu.dot_dimension_numbers<[1], [0], [0], [1], [0, 0, 1, 1], [], []>} : vector<1x10xf32>, vector<10x200xf32>, vector<1x200xf32> -> vector<1x200xf32>
    %c0_3 = arith.constant 0 : index
    %c0_4 = arith.constant 0 : index
    %3 = vector.load %arg3[%c0_3, %c0_4] : memref<1x200xf32, #tpu.memory_space<vmem>>, vector<1x200xf32>
    %4 = arith.addf %2, %3 : vector<1x200xf32>
    %5 = math.tanh %4 : vector<1x200xf32>
    %c0_5 = arith.constant 0 : index
    %c0_6 = arith.constant 0 : index
    %6 = vector.load %arg4[%c0_5, %c0_6] : memref<200x256xf32, #tpu.memory_space<vmem>>, vector<200x256xf32>
    %cst_7 = arith.constant dense<0.000000e+00> : vector<1x256xf32>
    %7 = tpu.matmul %5, %6, %cst_7 {dimension_numbers = #tpu.dot_dimension_numbers<[1], [0], [0], [1], [0, 0, 1, 1], [], []>} : vector<1x200xf32>, vector<200x256xf32>, vector<1x256xf32> -> vector<1x256xf32>
    %c0_8 = arith.constant 0 : index
    %c0_9 = arith.constant 0 : index
    %8 = vector.load %arg5[%c0_8, %c0_9] : memref<1x256xf32, #tpu.memory_space<vmem>>, vector<1x256xf32>
    %9 = arith.addf %7, %8 : vector<1x256xf32>
    %c0_10 = arith.constant 0 : index
    %c0_11 = arith.constant 0 : index
    %10 = vector.load %arg6[%c0_10, %c0_11] : memref<1x256xf32, #tpu.memory_space<vmem>>, vector<1x256xf32>
    tpu.vector_store %arg6[%c0_10, %c0_11], %9 {strides = array<i32>} : memref<1x256xf32, #tpu.memory_space<vmem>>, vector<1x256xf32>,
    return
  }
  func.func @transform_0(%arg0: i32) -> (i32, i32) {
    %c0_i32 = arith.constant 0 : i32
    %c0_i32_0 = arith.constant 0 : i32
    %c0_i32_1 = arith.constant 0 : i32
    return %c0_i32, %c0_i32_0 : i32, i32
  }
  func.func @transform_1(%arg0: i32) -> (i32, i32) {
    %c0_i32 = arith.constant 0 : i32
    %c0_i32_0 = arith.constant 0 : i32
    %c0_i32_1 = arith.constant 0 : i32
    return %c0_i32, %c0_i32_0 : i32, i32
  }
  func.func @transform_2(%arg0: i32) -> (i32, i32) {
    %c0_i32 = arith.constant 0 : i32
    %c0_i32_0 = arith.constant 0 : i32
    %c0_i32_1 = arith.constant 0 : i32
    return %c0_i32, %c0_i32_0 : i32, i32
  }
  func.func @transform_3(%arg0: i32) -> (i32, i32) {
    %c0_i32 = arith.constant 0 : i32
    %c0_i32_0 = arith.constant 0 : i32
    return %c0_i32, %arg0 : i32, i32
  }
  func.func @transform_4(%arg0: i32) -> (i32, i32) {
    %c0_i32 = arith.constant 0 : i32
    %c0_i32_0 = arith.constant 0 : i32
    return %c0_i32, %arg0 : i32, i32
  }
  func.func @transform_5(%arg0: i32) -> (i32, i32) {
    %c0_i32 = arith.constant 0 : i32
    %c0_i32_0 = arith.constant 0 : i32
    return %c0_i32, %arg0 : i32, i32
  }
}

</mosaic_0001>

<bundles_post_ra>
// kernel: tpu_custom_call.1
= control target key start
LH: loop header
LB: loop body
LE: loop exit
PB: predicated region body
PF: predicated region fallthrough
CT: control target
= control target key end

     0   :  { %10 = vsyncpa [#allocation3], 0  ;;  %s609_s0 = inlined_call_operand.hbm [shape: f32[1,10], index: 0, kind: input, shape index: {}]   ;;  %s610_s1 = inlined_call_operand.hbm [shape: f32[10,200], index: 1, kind: input, shape index: {}]   ;;  %s611_s2 = inlined_call_operand.vmem [shape: f32[1,200], index: 2, kind: input, shape index: {}]   ;;  %s612_s3 = inlined_call_operand.hbm [shape: f32[200,256], index: 3, kind: input, shape index: {}]   ;;  %s613_s4 = inlined_call_operand.vmem [shape: f32[1,256], index: 4, kind: input, shape index: {}]   ;;  %s614_s5 = inlined_call_operand.hbm [shape: f32[1,256], index: 5, kind: output, shape index: {}]  }
   0x1   :  { %11 = vsyncpa [#allocation6], 0 }
   0x2   :  { %12 = vsyncpa [#allocation4], 0  ;;  %s502_s18 = smov [#allocation5]   ;;  %s408_s22 = scalar_lea.hbm %s610_s1, 512 }
   0x3   :  { %s28_s19 = sshll.u32 %s502_s18, 4  ;;  %p409_p0 = scmp.ne.s32.totalorder %s610_s1, %s408_s22  ;;  %s29_s19 = int_to_ptr.vmem [resolvable:$true] %s28_s19 }
   0x4   :  { %p412_p1 = scmp.lt.u32.totalorder %s408_s22, %s610_s1 }
   0x6   :  { %p414_p2 = pnand %p412_p1, %p409_p0 }
   0x8   :  { %417 = shalt.err (!%p414_p2)
}
   0x9   :  { %s418_s27 = scalar_lea.vmem %s29_s19, 512  ;;  %p423_p4 = scmp.lt.s32.totalorder %s29_s19, %s29_s19 }
   0xa   :  { %p419_p3 = scmp.ne.s32.totalorder %s29_s19, %s418_s27  ;;  %p424_p5 = scmp.lt.s32.totalorder %s418_s27, %s418_s27 }
   0xc   :  { %p425_p6 = por %p424_p5, %p423_p4 }
   0xe   :  { %p426_p7 = pnand %p425_p6, %p419_p3 }
  0x10   :  { %429 = shalt.err (!%p426_p7)
}
  0x11   :  { %s503_s28 = smov 256   ;;  %s504_s29 = smov 16  }
  0x12   :  { %34 = dma.hbm_to_vmem [thread:$0]  %s610_s1, 512, %s29_s19, [#allocation6], %s503_s28, %s503_s28, %s504_s29  }
  0x13   :  { %s505_s7 = smov [#allocation2]   ;;  %s506_s9 = smov [#allocation7]  }
  0x14   :  { %s19_s8 = sshll.u32 %s505_s7, 4  ;;  %s42_s10 = sshll.u32 %s506_s9, 4  ;;  %s20_s8 = int_to_ptr.vmem [resolvable:$true] %s19_s8  ;;  %s43_s10 = int_to_ptr.vmem [resolvable:$true] %s42_s10 }
  0x15   :  { %s430_s13 = scalar_lea.hbm %s609_s0, 16 }
  0x16   :  { %p431_p8 = scmp.ne.s32.totalorder %s609_s0, %s430_s13  ;;  %p434_p9 = scmp.lt.u32.totalorder %s430_s13, %s609_s0 }
  0x18   :  { %p436_p10 = pnand %p434_p9, %p431_p8 }
  0x1a   :  { %439 = shalt.err (!%p436_p10)
}
  0x1b   :  { %s440_s1 = scalar_lea.vmem %s20_s8, 16  ;;  %s444_s18 = scalar_lea.vmem %s20_s8, 32 }
  0x1c   :  { %p441_p11 = scmp.ne.s32.totalorder %s20_s8, %s440_s1  ;;  %p445_p12 = scmp.lt.s32.totalorder %s20_s8, %s20_s8 }
  0x1d   :  { %p446_p13 = scmp.lt.s32.totalorder %s444_s18, %s440_s1 }
  0x1f   :  { %p447_p0 = por %p446_p13, %p445_p12 }
  0x21   :  { %p448_p1 = pnand %p447_p0, %p441_p11 }
  0x23   :  { %451 = shalt.err (!%p448_p1)
}
  0x24   :  { %22 = dma.hbm_to_vmem [thread:$0]  %s609_s0, 16, %s20_s8, [#allocation3]  }
  0x25   :  { %s452_s23 = scalar_lea.hbm %s612_s3, 6400 }
  0x26   :  { %p453_p2 = scmp.ne.s32.totalorder %s612_s3, %s452_s23  ;;  %p456_p3 = scmp.lt.u32.totalorder %s452_s23, %s612_s3 }
  0x28   :  { %p458_p4 = pnand %p456_p3, %p453_p2 }
  0x2a   :  { %461 = shalt.err (!%p458_p4)
}
  0x2b   :  { %s462_s30 = scalar_lea.vmem %s43_s10, 6400  ;;  %p467_p6 = scmp.lt.s32.totalorder %s43_s10, %s43_s10 }
  0x2c   :  { %p463_p5 = scmp.ne.s32.totalorder %s43_s10, %s462_s30  ;;  %p468_p7 = scmp.lt.s32.totalorder %s462_s30, %s462_s30 }
  0x2e   :  { %p469_p8 = por %p468_p7, %p467_p6 }
  0x30   :  { %p470_p9 = pnand %p469_p8, %p463_p5 }
  0x32   :  { %473 = shalt.err (!%p470_p9)
}
  0x33   :  { %48 = dma.hbm_to_vmem [thread:$0]  %s612_s3, 6400, %s43_s10, [#allocation6], %s503_s28, %s503_s28, %s504_s29  }
  0x34   :  { %496 = dma.done.wait [#allocation3], 16  }
  0x35   :  { %497 = vsyncadd [#allocation3], 4294967280 }
  0x36   :  { %498 = dma.done.wait [#allocation6], 6912  }
  0x37   :  { %499 = vsyncadd [#allocation6], 4294960384  ;;  %v507_v0 = vmov 0.0   ;;  %vm81_vm0 = vcmask 1041408   ;;  %vm508_vm1 = vmmov 1   ;;  %v62_v2 = vld [vmem:[#allocation5 + $0x8] sm:$0xff] }
  0x38   :  { %152 = vmatprep.mubr.f32.mxu0 %v507_v0  ;;  %vm583_vm2 = vmpackc.low %vm81_vm0, %vm508_vm1  ;;  %v64_v3 = vld [vmem:[#allocation5 + $0x18] sm:$0x3]  ;;  %v61_v4 = vld [vmem:[#allocation5] sm:$0xff]  ;;  %vm77_vm3 = vcmask 80896   ;;  %vm223_vm4 = vcmask 588800  }
  0x39   :  { %v341_v5 = vpack.c.bf16 %v64_v3, %v62_v2  ;;  %v63_v6 = vld [vmem:[#allocation5 + $0x10] sm:$0x3]  ;;  %v162_v7 = vld [vmem:[#allocation7 + $0x8] sm:$0xff]  ;;  %v60_v9 = vld [vmem:[#allocation2] sm:$0x1] }
  0x3a   :  { %v344_v8 = vpack.c.bf16 %v63_v6, %v61_v4  ;;  %v164_v10 = vld [vmem:[#allocation7 + $0x18] sm:$0xff]  ;;  %v161_v11 = vld [vmem:[#allocation7] sm:$0xff]  ;;  %v163_v12 = vld [vmem:[#allocation7 + $0x10] sm:$0xff] }
  0x3b   :  { %343 = vmatprep.subr.msk.bf16.mxu0 %vm583_vm2, %v341_v5  ;;  %v347_v13 = vpack.c.bf16 %v164_v10, %v162_v7  ;;  %v349_v14 = vpack.c.bf16 %v163_v12, %v161_v11  ;;  %v166_v15 = vld [vmem:[#allocation7 + $0x28] sm:$0xff]  ;;  %v168_v16 = vld [vmem:[#allocation7 + $0x38] sm:$0xff]  ;;  %v165_v17 = vld [vmem:[#allocation7 + $0x20] sm:$0xff] }
  0x3c   :  { %346 = vmatpush1.bf16.msk.msra.mxu0 %vm583_vm2, %v344_v8  ;;  %v351_v18 = vpack.c.bf16 %v168_v16, %v166_v15  ;;  %v167_v19 = vld [vmem:[#allocation7 + $0x30] sm:$0xff]  ;;  %v170_v20 = vld [vmem:[#allocation7 + $0x48] sm:$0xff]  ;;  %v172_v21 = vld [vmem:[#allocation7 + $0x58] sm:$0xff] }
  0x3d   :  { %348 = vmatprep.subr.bf16.mxu1 %v347_v13  ;;  %v353_v22 = vpack.c.bf16 %v167_v19, %v165_v17  ;;  %v355_v23 = vpack.c.bf16 %v172_v21, %v170_v20  ;;  %v169_v24 = vld [vmem:[#allocation7 + $0x40] sm:$0xff]  ;;  %v171_v25 = vld [vmem:[#allocation7 + $0x50] sm:$0xff]  ;;  %v174_v26 = vld [vmem:[#allocation7 + $0x68] sm:$0xff]  ;;  %v67_v19 = vlaneseq }
  0x3e   :  { %350 = vmatpush1.bf16.msra.mxu1 %v349_v14  ;;  %v176_v27 = vld [vmem:[#allocation7 + $0x78] sm:$0xff]  ;;  %v357_v28 = vpack.c.bf16 %v171_v25, %v169_v24  ;;  %v173_v30 = vld [vmem:[#allocation7 + $0x60] sm:$0xff]  ;;  %v175_v31 = vld [vmem:[#allocation7 + $0x70] sm:$0xff] }
  0x3f   :  { %339 = vmatmul.mubr.msk.f32.vlgmr.msra.gmra.mrb[0].mxu0 %vm77_vm3, %v60_v9  ;;  %352 = vmatprep.subr.bf16.mxu1 %v351_v18  ;;  %v359_v29 = vpack.c.bf16 %v176_v27, %v174_v26  ;;  %v178_v32 = vld [vmem:[#allocation7 + $0x88] sm:$0xff]  ;;  %v180_v33 = vld [vmem:[#allocation7 + $0x98] sm:$0xff]  ;;  %v361_v34 = vpack.c.bf16 %v175_v31, %v173_v30  ;;  %v177_v36 = vld [vmem:[#allocation7 + $0x80] sm:$0xff]  ;;  %v68_v20 = vshrl.u32 %v67_v19, 7  ;;  %vm318_vm5 = vcmp.lt.s32.totalorder %v67_v19, 256 }
  0x40   :  { %v363_v35 = vpack.c.bf16 %v180_v33, %v178_v32  ;;  %v179_v37 = vld [vmem:[#allocation7 + $0x90] sm:$0xff]  ;;  %v182_v38 = vld [vmem:[#allocation7 + $0xa8] sm:$0xff]  ;;  %v184_v39 = vld [vmem:[#allocation7 + $0xb8] sm:$0xff]  ;;  %v509_v33 = vmov 1966171168  }
  0x41   :  { %v365_v40 = vpack.c.bf16 %v179_v37, %v177_v36  ;;  %v367_v41 = vpack.c.bf16 %v184_v39, %v182_v38  ;;  %v181_v42 = vld [vmem:[#allocation7 + $0xa0] sm:$0xff]  ;;  %v183_v43 = vld [vmem:[#allocation7 + $0xb0] sm:$0xff]  ;;  %v186_v44 = vld [vmem:[#allocation7 + $0xc8] sm:$0xff]  ;;  %v69_v21 = vsub.s32 0, %v68_v20 }
  0x42   :  { %354 = vmatpush1.bf16.msra.mxu1 %v353_v22  ;;  %v188_v45 = vld [vmem:[#allocation7 + $0xd8] sm:$0xff]  ;;  %v369_v46 = vpack.c.bf16 %v183_v43, %v181_v42  ;;  %v185_v48 = vld [vmem:[#allocation7 + $0xc0] sm:$0xff]  ;;  %v187_v49 = vld [vmem:[#allocation7 + $0xd0] sm:$0xff] }
  0x43   :  { %356 = vmatprep.subr.bf16.mxu1 %v355_v23  ;;  %v371_v47 = vpack.c.bf16 %v188_v45, %v186_v44  ;;  %v190_v50 = vld [vmem:[#allocation7 + $0xe8] sm:$0xff]  ;;  %v192_v51 = vld [vmem:[#allocation7 + $0xf8] sm:$0xff]  ;;  %v373_v52 = vpack.c.bf16 %v187_v49, %v185_v48  ;;  %v189_v54 = vld [vmem:[#allocation7 + $0xe0] sm:$0xff]  ;;  %v73_v23 = vsub.s32 1, %v68_v20 }
  0x44   :  { %v375_v53 = vpack.c.bf16 %v192_v51, %v190_v50  ;;  %v191_v55 = vld [vmem:[#allocation7 + $0xf0] sm:$0xff]  ;;  %v194_v56 = vld [vmem:[#allocation7 + $0x108] sm:$0xff]  ;;  %v196_v57 = vld [vmem:[#allocation7 + $0x118] sm:$0xff] }
  0x45   :  { %v377_v58 = vpack.c.bf16 %v191_v55, %v189_v54  ;;  %v379_v59 = vpack.c.bf16 %v196_v57, %v194_v56  ;;  %v193_v60 = vld [vmem:[#allocation7 + $0x100] sm:$0xff]  ;;  %v195_v61 = vld [vmem:[#allocation7 + $0x110] sm:$0xff]  ;;  %v198_v63 = vld [vmem:[#allocation7 + $0x128] sm:$0xff] }
  0x46   :  { %358 = vmatpush1.bf16.msra.mxu1 %v357_v28  ;;  %v381_v62 = vpack.c.bf16 %v195_v61, %v193_v60  ;;  %v200_v0 = vld [vmem:[#allocation7 + $0x138] sm:$0xff]  ;;  %v197_v2 = vld [vmem:[#allocation7 + $0x120] sm:$0xff]  ;;  %v199_v3 = vld [vmem:[#allocation7 + $0x130] sm:$0xff] }
  0x47   :  { %360 = vmatprep.subr.bf16.mxu1 %v359_v29  ;;  %v383_v1 = vpack.c.bf16 %v200_v0, %v198_v63  ;;  %v385_v4 = vpack.c.bf16 %v199_v3, %v197_v2  ;;  %v202_v5 = vld [vmem:[#allocation7 + $0x148] sm:$0xff]  ;;  %v204_v6 = vld [vmem:[#allocation7 + $0x158] sm:$0xff]  ;;  %v201_v8 = vld [vmem:[#allocation7 + $0x140] sm:$0xff] }
  0x48   :  { %v387_v7 = vpack.c.bf16 %v204_v6, %v202_v5  ;;  %v203_v9 = vld [vmem:[#allocation7 + $0x150] sm:$0xff]  ;;  %v206_v10 = vld [vmem:[#allocation7 + $0x168] sm:$0xff]  ;;  %v208_v12 = vld [vmem:[#allocation7 + $0x178] sm:$0xff] }
  0x49   :  { %v389_v11 = vpack.c.bf16 %v203_v9, %v201_v8  ;;  %v205_v13 = vld [vmem:[#allocation7 + $0x160] sm:$0xff]  ;;  %v207_v14 = vld [vmem:[#allocation7 + $0x170] sm:$0xff]  ;;  %v391_v15 = vpack.c.bf16 %v208_v12, %v206_v10  ;;  %v210_v17 = vld [vmem:[#allocation7 + $0x188] sm:$0xff] }
  0x4a   :  { %362 = vmatpush1.bf16.msra.mxu1 %v361_v34  ;;  %v393_v16 = vpack.c.bf16 %v207_v14, %v205_v13  ;;  %v209_v18 = vld [vmem:[#allocation7 + $0x180] sm:$0xff]  ;;  %v65_v22 = vld [vmem:[%s611_s2] sm:$0x3]  ;;  %v302_v34 = vunpack.c.l.s4 %v509_v33  ;;  %s510_s2 = smov [#allocation8]  }
  0x4b   :  { %364 = vmatprep.subr.bf16.mxu1 %v363_v35  ;;  %v70_v24 = vrot.slane %v65_v22, %v69_v21  ;;  %v74_v25 = vrot.slane %v65_v22, %v73_v23  ;;  %v211_v32 = vld [vmem:[%s613_s4] sm:$0x3]  ;;  %s327_s8 = sshll.u32 %s510_s2, 4  ;;  %s328_s8 = int_to_ptr.vmem [resolvable:$true] %s327_s8 }
  0x4c   :  { %v216_v35 = vrot.slane %v211_v32, %v69_v21  ;;  %v220_v36 = vrot.slane %v211_v32, %v73_v23  ;;  %v303_v37 = vunpack.c.0.s8 %v302_v34  ;;  %s474_s9 = scalar_lea.vmem %s328_s8, 32  ;;  %p479_p11 = scmp.lt.s32.totalorder %s328_s8, %s328_s8 }
  0x4d   :  { %p475_p10 = scmp.ne.s32.totalorder %s328_s8, %s474_s9  ;;  %p480_p12 = scmp.lt.s32.totalorder %s474_s9, %s474_s9 }
  0x4e   :  { %366 = vmatpush1.bf16.msra.mxu1 %v365_v40  ;;  %v306_v42 = vsub.s32 %v303_v37, %v68_v20 }
  0x4f   :  { %368 = vmatprep.subr.bf16.mxu1 %v367_v41  ;;  %p481_p13 = por %p480_p12, %p479_p11 }
  0x51   :  { %p482_p0 = pnand %p481_p13, %p475_p10 }
  0x52   :  { %370 = vmatpush1.bf16.msra.mxu1 %v369_v46 }
  0x53   :  { %372 = vmatprep.subr.bf16.mxu1 %v371_v47 }
  0x56   :  { %374 = vmatpush1.bf16.msra.mxu1 %v373_v52 }
  0x57   :  { %376 = vmatprep.subr.bf16.mxu1 %v375_v53 }
  0x5a   :  { %378 = vmatpush1.bf16.msra.mxu1 %v377_v58 }
  0x5b   :  { %380 = vmatprep.subr.bf16.mxu1 %v379_v59 }
  0x5e   :  { %382 = vmatpush1.bf16.msra.mxu1 %v381_v62 }
  0x5f   :  { %384 = vmatprep.subr.bf16.mxu1 %v383_v1 }
  0x62   :  { %386 = vmatpush1.bf16.msra.mxu1 %v385_v4 }
  0x63   :  { %388 = vmatprep.subr.bf16.mxu1 %v387_v7 }
  0x66   :  { %390 = vmatpush1.bf16.msra.mxu1 %v389_v11 }
  0x67   :  { %392 = vmatprep.subr.bf16.mxu1 %v391_v15 }
  0x6a   :  { %394 = vmatpush1.bf16.msra.mxu1 %v393_v16 }
  0x6b   :  { %275 = vmatprep.subr.mxu1 %v210_v17 }
  0x6e   :  { %276 = vmatpush1.msra.mxu1 %v209_v18 }
 0x112   :  { %v154_v26 = vpop.f32.mrb[0].mxu0 }
 0x113   :  { %v155_v27 = vadd.f32 %v154_v26, %v70_v24  ;;  %v156_v28 = vpop.f32.mrb[1].mxu0 }
 0x114   :  { %v157_v29 = vadd.f32 %v156_v28, %v74_v25 }
 0x116   :  { %404 = vtanh.f32 %v157_v29 }
 0x117   :  { %406 = vtanh.f32 %v155_v27 }
 0x120   :  { %v405_v30 = vpop.eup %404 }
 0x121   :  { %v407_v31 = vpop.eup %406  ;;  %340 = vmatprep.mubr.msk.f32.mxu1 %vm223_vm4, %v405_v30 }
 0x122   :  { %292 = vmatmul.mubr.f32.vlgmr.msra.gmra.mrb[0].mxu1 %v407_v31 }
 0x1f5   :  { %v293_v38 = vpop.f32.mrb[0].mxu1 }
 0x1f6   :  { %v294_v39 = vadd.f32 %v293_v38, %v216_v35  ;;  %v295_v40 = vpop.f32.mrb[1].mxu1 }
 0x1f7   :  { %v296_v41 = vadd.f32 %v295_v40, %v220_v36 }
 0x1f9   :  { %v300_v43 = vcombine.low %v294_v39, %v296_v41 }
 0x1fb   :  { %v307_v44 = vrot.slane %v300_v43, %v306_v42 }
 0x1fd   :  { %v314_v45 = vrot.slane %v307_v44, %v306_v42 }
 0x1ff   :  { %320 = vst.msk [vmem:[#allocation8] sm:$0x3] %vm318_vm5, %v314_v45 }
 0x200   :  { %485 = shalt.err (!%p482_p0)
}
 0x201   :  { %s486_s11 = scalar_lea.hbm %s614_s5, 32 }
 0x202   :  { %p487_p1 = scmp.ne.s32.totalorder %s614_s5, %s486_s11  ;;  %p490_p2 = scmp.lt.u32.totalorder %s486_s11, %s614_s5 }
 0x204   :  { %p492_p3 = pnand %p490_p2, %p487_p1 }
 0x206   :  { %495 = shalt.err (!%p492_p3)
}
 0x207   :  { %330 = dma.vmem_to_hbm [thread:$0]  %s328_s8, 32, %s614_s5, [#allocation4]  }
 0x208   :  { %500 = dma.done.wait [#allocation4], 32  }
 0x209   :  { %501 = vsyncadd [#allocation4], 4294967264 }
 0x20a   :  { %334 = vsyncpa [#allocation3], 1 }
 0x20b   :  { %335 = vsyncpa [#allocation6], 1 }
 0x20c   :  { %336 = vsyncpa [#allocation4], 1 }

</bundles_post_ra>
